<compile_context>
chip_gen: v7x
topology: tpu7x:2x2x1
jax: 0.10.0
libtpu: 0.0.40
codegen_flags: <defaults>
</compile_context>

<pallas_src>
import functools

import jax
import jax.numpy as jnp
from jax import lax
from jax.experimental import pallas as pl
from jax.experimental.pallas import tpu as pltpu

LN_EPS = 1e-5
NEG_INF = -1e30       # finite "minus infinity" -> no inf-inf NaN edge cases
_LANE = 128


# ---------------------------------------------------------------------------
# Pass 1: attention pooling (online softmax over HW tiles)  ->  ctx (B, C, 1)
# ---------------------------------------------------------------------------
def _pool_kernel(x_ref, w_ref, b_ref, ctx_ref, m_sc, s_sc, acc_sc,
                 *, thw, hw_valid, apply_mask):
    t = pl.program_id(1)
    nt = pl.num_programs(1)

    @pl.when(t == 0)
    def _():
        m_sc[...] = jnp.full(m_sc.shape, NEG_INF, m_sc.dtype)
        s_sc[...] = jnp.zeros(s_sc.shape, s_sc.dtype)
        acc_sc[...] = jnp.zeros(acc_sc.shape, acc_sc.dtype)

    x = x_ref[0]                                                   # (C, THW) f32

    # conv_mask (1x1, C->1) as VPU broadcast-multiply + reduce over C:
    # keeps the MXU slot free (an M=1 matmul wastes a whole vmatmul push).
    logits = jnp.sum(x * w_ref[...], axis=0, keepdims=True) + b_ref[...]  # (1,THW)

    if apply_mask:  # trace-time constant; only emitted when HW was padded
        pos = t * thw + lax.broadcasted_iota(jnp.int32, (1, thw), 1)
        logits = jnp.where(pos < hw_valid, logits, NEG_INF)

    # Online-softmax update with deferred normalization.
    m_new = jnp.maximum(m_sc[...], jnp.max(logits, axis=-1, keepdims=True))  # (1,1)
    alpha = jnp.exp(m_sc[...] - m_new)                                       # (1,1)
    e = jnp.exp(logits - m_new)                                              # (1,THW)
    s_sc[...] = alpha * s_sc[...] + jnp.sum(e, axis=-1, keepdims=True)
    acc_sc[...] = alpha * acc_sc[...] + jnp.sum(x * e, axis=-1, keepdims=True)  # (C,1)
    m_sc[...] = m_new

    @pl.when(t == nt - 1)
    def _():
        # Exact reciprocal (approx=True would add ~1e-3 drift vs PyTorch).
        ctx_ref[0] = acc_sc[...] * pl.reciprocal(s_sc[...], approx=False)


# ---------------------------------------------------------------------------
# Pass 2: channel_add transform (once per batch) + broadcast add (in place)
# ---------------------------------------------------------------------------
def _fuse_kernel(x_ref, ctx_ref, w1_ref, b1_ref, g_ref, beta_ref,
                 w2_ref, b2_ref, out_ref, add_sc):
    @pl.when(pl.program_id(1) == 0)
    def _():
        # Runs ONCE per batch element (not per HW tile) and is cached in VMEM
        # scratch, so it is off the per-tile critical path.  Column layout
        # (C,1)/(planes,1) is kept on purpose: the result must broadcast over
        # the lane (HW) axis of x below without a transpose.
        ctx = ctx_ref[0]                                                     # (C,1)
        h = jnp.dot(w1_ref[...], ctx,
                    preferred_element_type=jnp.float32) + b1_ref[...]        # (P,1)
        mu = jnp.mean(h, axis=0, keepdims=True)
        var = jnp.mean(jnp.square(h - mu), axis=0, keepdims=True)
        h = (h - mu) * lax.rsqrt(var + LN_EPS)
        h = h * g_ref[...] + beta_ref[...]                                   # LayerNorm
        h = jnp.maximum(h, 0.0)                                              # ReLU
        add_sc[...] = jnp.dot(w2_ref[...], h,
                              preferred_element_type=jnp.float32) + b2_ref[...]  # (C,1)

    out_ref[0] = (x_ref[0] + add_sc[...]).astype(out_ref.dtype)


# ---------------------------------------------------------------------------
# Wrapper
# ---------------------------------------------------------------------------
def _choose_hw_tile(c, hw, *, budget_bytes=16 << 20, min_tiles=2):
    """HW tile width: multiple of 128, in+out double-buffered f32 tiles fit
    `budget_bytes`, and (when the spatial extent allows) >= min_tiles tiles
    per batch so the DMA pipeline has depth even for small B."""
    hw_lane = -(-hw // _LANE) * _LANE
    # 4 bytes * (in + out) * double-buffer = 16 bytes per f32 tile element.
    cap = max(_LANE, (budget_bytes // (16 * c)) // _LANE * _LANE)
    thw = min(hw_lane, cap)
    if hw_lane // thw < min_tiles and hw_lane >= min_tiles * _LANE:
        want = -(-hw_lane // min_tiles)
        thw = min(thw, -(-want // _LANE) * _LANE)
    hw_pad = -(-hw // thw) * thw
    return thw, hw_pad


def _vmem_limit_bytes(c, planes, thw):
    tile = 4 * c * thw                                         # one f32 x/out tile
    consts = 4 * (c + 1 + 2 * planes * c + 3 * planes + 2 * c) # weights + ctx + scratch
    # in + out, double-buffered, plus resident constants and headroom.
    return int(min(60 << 20, max(32 << 20, 4 * tile + 2 * consts + (4 << 20))))


@jax.jit
def context_block(x, params):
    """x: (B, C, H, W) float32 NCHW. Returns (B, C, H, W)."""
    B, C, H, W = x.shape
    HW = H * W
    planes = params["w1"].shape[0]
    thw, hw_pad = _choose_hw_tile(C, HW)
    num_t = hw_pad // thw
    vmem = _vmem_limit_bytes(C, planes, thw)

    x_flat = x.reshape(B, C, HW).astype(jnp.float32)
    if hw_pad != HW:  # pad ragged HW to a lane-dense multiple of the tile
        x_flat = jnp.pad(x_flat, ((0, 0), (0, 0), (0, hw_pad - HW)))

    cparams = pltpu.CompilerParams(
        dimension_semantics=("parallel", "arbitrary"),  # B across cores (v7x)
        vmem_limit_bytes=vmem)

    # ---- pass 1: attention pooling -> ctx (B, C, 1) -----------------------
    pool = functools.partial(_pool_kernel, thw=thw, hw_valid=HW,
                             apply_mask=(hw_pad != HW))
    ctx = pl.pallas_call(
        pool,
        out_shape=jax.ShapeDtypeStruct((B, C, 1), jnp.float32),
        grid_spec=pltpu.PrefetchScalarGridSpec(
            num_scalar_prefetch=0,
            grid=(B, num_t),
            in_specs=[
                pl.BlockSpec((1, C, thw), lambda b, t: (b, 0, t)),   # x tile
                pl.BlockSpec((C, 1), lambda b, t: (0, 0)),           # conv_mask W
                pl.BlockSpec((1, 1), lambda b, t: (0, 0)),           # conv_mask b
            ],
            out_specs=pl.BlockSpec((1, C, 1), lambda b, t: (b, 0, 0)),
            scratch_shapes=[pltpu.VMEM((1, 1), jnp.float32),    # running max
                            pltpu.VMEM((1, 1), jnp.float32),    # running sum(exp)
                            pltpu.VMEM((C, 1), jnp.float32)],   # running sum(x*exp)
        ),
        compiler_params=cparams,
    )(x_flat, params["w_mask"], params["b_mask"])

    # ---- pass 2: channel_add transform + broadcast add (aliased to x) -----
    out_flat = pl.pallas_call(
        _fuse_kernel,
        out_shape=jax.ShapeDtypeStruct((B, C, hw_pad), jnp.float32),
        grid_spec=pltpu.PrefetchScalarGridSpec(
            num_scalar_prefetch=0,
            grid=(B, num_t),
            in_specs=[
                pl.BlockSpec((1, C, thw), lambda b, t: (b, 0, t)),   # x tile
                pl.BlockSpec((1, C, 1), lambda b, t: (b, 0, 0)),     # ctx
                pl.BlockSpec((planes, C), lambda b, t: (0, 0)),      # conv1 W
                pl.BlockSpec((planes, 1), lambda b, t: (0, 0)),      # conv1 b
                pl.BlockSpec((planes, 1), lambda b, t: (0, 0)),      # LN gamma
                pl.BlockSpec((planes, 1), lambda b, t: (0, 0)),      # LN beta
                pl.BlockSpec((C, planes), lambda b, t: (0, 0)),      # conv2 W
                pl.BlockSpec((C, 1), lambda b, t: (0, 0)),           # conv2 b
            ],
            out_specs=pl.BlockSpec((1, C, thw), lambda b, t: (b, 0, t)),
            scratch_shapes=[pltpu.VMEM((C, 1), jnp.float32)],        # cached add term
        ),
        compiler_params=cparams,
        input_output_aliases={0: 0},   # out = x + add is elementwise on x
    )(x_flat, ctx, params["w1"], params["b1"], params["gamma"],
      params["beta"], params["w2"], params["b2"])

    if hw_pad != HW:
        out_flat = out_flat[:, :, :HW]
    return out_flat.reshape(B, C, H, W).astype(x.dtype)


# ---------------------------------------------------------------------------
# Pure-JAX reference (mirrors the PyTorch forward exactly)
# ---------------------------------------------------------------------------
def context_block_reference(x, params):
    B, C, H, W = x.shape
    xf = x.reshape(B, C, H * W).astype(jnp.float32)

    logits = jnp.einsum("bcs,c->bs", xf, params["w_mask"][:, 0]) + params["b_mask"][0, 0]
    mask = jax.nn.softmax(logits, axis=-1)                       # (B, HW)
    ctx = jnp.einsum("bcs,bs->bc", xf, mask)                     # (B, C)

    t = jnp.einsum("pc,bc->bp", params["w1"], ctx) + params["b1"][:, 0]
    mu = jnp.mean(t, axis=-1, keepdims=True)
    var = jnp.mean((t - mu) ** 2, axis=-1, keepdims=True)
    t = (t - mu) / jnp.sqrt(var + LN_EPS)
    t = t * params["gamma"][:, 0] + params["beta"][:, 0]
    t = jnp.maximum(t, 0.0)
    add = jnp.einsum("cp,bp->bc", params["w2"], t) + params["b2"][:, 0]

    return x + add[:, :, None, None].astype(x.dtype)


def init_params(key, in_channels, ratio):
    planes = max(1, int(in_channels * ratio))
    ks = jax.random.split(key, 5)
    scale_mask = (2.0 / in_channels) ** 0.5   # kaiming fan_in-ish
    return {
        "w_mask": jax.random.normal(ks[0], (in_channels, 1), jnp.float32) * scale_mask,
        "b_mask": jnp.zeros((1, 1), jnp.float32),
        "w1": jax.random.normal(ks[1], (planes, in_channels), jnp.float32) * 0.2,
        "b1": jax.random.normal(ks[2], (planes, 1), jnp.float32) * 0.1,
        "gamma": jnp.ones((planes, 1), jnp.float32),
        "beta": jnp.zeros((planes, 1), jnp.float32),
        # The real module zero-inits this last conv (last_zero_init); use
        # non-zero values here so the full compute path is exercised.
        "w2": jax.random.normal(ks[3], (in_channels, planes), jnp.float32) * 0.2,
        "b2": jax.random.normal(ks[4], (in_channels, 1), jnp.float32) * 0.1,
    }


if __name__ == "__main__":
    B, C, H, W = 2, 4, 16, 16
    ratio = 0.5
    key = jax.random.PRNGKey(0)
    kx, kp = jax.random.split(key)
    x = jax.random.normal(kx, (B, C, H, W), jnp.float32)
    params = init_params(kp, C, ratio)

    ref = context_block_reference(x, params)

    out = context_block(x, params)
    out = jax.block_until_ready(out)

    assert out.shape == (B, C, H, W)
    assert jnp.allclose(out, ref, atol=1e-4, rtol=1e-4), "mismatch vs reference"

    print("KERNEL_OK")
</pallas_src>

<mosaic_0001>
module attributes {stable_mosaic.version = 11 : i64} {
  func.func @_pool_kernel(%arg0: i32, %arg1: i32, %arg2: memref<1x4x128xf32, #tpu.memory_space<vmem>>, %arg3: memref<4x1xf32, #tpu.memory_space<vmem>>, %arg4: memref<1x1xf32, #tpu.memory_space<vmem>>, %arg5: memref<1x4x1xf32, #tpu.memory_space<vmem>>, %arg6: memref<1x1xf32, #tpu.memory_space<vmem>>, %arg7: memref<1x1xf32, #tpu.memory_space<vmem>>, %arg8: memref<4x1xf32, #tpu.memory_space<vmem>>) attributes {dimension_semantics = [#tpu.dimension_semantics<parallel>, #tpu.dimension_semantics<arbitrary>], iteration_bounds = array<i64: 2, 2>, scalar_prefetch = 0 : i64, scratch_operands = 3 : i64, tpu.core_type = #tpu.core_type<tc>, window_params = [{transform_indices = @transform_0, window_bounds = array<i64: 1, 4, 128>}, {pipeline_mode = #tpu.pipeline_mode<synchronous>, transform_indices = @transform_1, window_bounds = array<i64: 4, 1>}, {pipeline_mode = #tpu.pipeline_mode<synchronous>, transform_indices = @transform_2, window_bounds = array<i64: 1, 1>}, {transform_indices = @transform_3, window_bounds = array<i64: 1, 4, 1>}]} {
    %c0_i32 = arith.constant 0 : i32
    %0 = arith.cmpi eq, %arg1, %c0_i32 : i32
    %1 = arith.extui %0 : i1 to i32
    %c0_i32_0 = arith.constant 0 : i32
    %2 = arith.cmpi ne, %1, %c0_i32_0 : i32
    scf.if %2 {
      %cst_25 = arith.constant -1.000000e+30 : f32
      %42 = vector.broadcast %cst_25 : f32 to vector<1x1xf32>
      %c0_26 = arith.constant 0 : index
      %c0_27 = arith.constant 0 : index
      %43 = vector.load %arg6[%c0_26, %c0_27] : memref<1x1xf32, #tpu.memory_space<vmem>>, vector<1x1xf32>
      tpu.vector_store %arg6[%c0_26, %c0_27], %42 {strides = array<i32>} : memref<1x1xf32, #tpu.memory_space<vmem>>, vector<1x1xf32>,
      %cst_28 = arith.constant 0.000000e+00 : f32
      %44 = vector.broadcast %cst_28 : f32 to vector<1x1xf32>
      %c0_29 = arith.constant 0 : index
      %c0_30 = arith.constant 0 : index
      %45 = vector.load %arg7[%c0_29, %c0_30] : memref<1x1xf32, #tpu.memory_space<vmem>>, vector<1x1xf32>
      tpu.vector_store %arg7[%c0_29, %c0_30], %44 {strides = array<i32>} : memref<1x1xf32, #tpu.memory_space<vmem>>, vector<1x1xf32>,
      %cst_31 = arith.constant 0.000000e+00 : f32
      %46 = vector.broadcast %cst_31 : f32 to vector<4x1xf32>
      %c0_32 = arith.constant 0 : index
      %c0_33 = arith.constant 0 : index
      %47 = vector.load %arg8[%c0_32, %c0_33] : memref<4x1xf32, #tpu.memory_space<vmem>>, vector<4x1xf32>
      tpu.vector_store %arg8[%c0_32, %c0_33], %46 {strides = array<i32>} : memref<4x1xf32, #tpu.memory_space<vmem>>, vector<4x1xf32>,
    } else {
    }
    %c0 = arith.constant 0 : index
    %c0_1 = arith.constant 0 : index
    %c0_2 = arith.constant 0 : index
    %3 = vector.load %arg2[%c0, %c0_1, %c0_2] : memref<1x4x128xf32, #tpu.memory_space<vmem>>, vector<1x4x128xf32>
    %4 = vector.shape_cast %3 : vector<1x4x128xf32> to vector<4x128xf32>
    %c0_3 = arith.constant 0 : index
    %c0_4 = arith.constant 0 : index
    %5 = vector.load %arg3[%c0_3, %c0_4] : memref<4x1xf32, #tpu.memory_space<vmem>>, vector<4x1xf32>
    %6 = vector.broadcast %5 : vector<4x1xf32> to vector<4x128xf32>
    %7 = arith.mulf %4, %6 : vector<4x128xf32>
    %cst = arith.constant dense<0.000000e+00> : vector<128xf32>
    %8 = vector.multi_reduction <add>, %7, %cst [0] : vector<4x128xf32> to vector<128xf32>
    %9 = vector.shape_cast %8 : vector<128xf32> to vector<1x128xf32>
    %c0_5 = arith.constant 0 : index
    %c0_6 = arith.constant 0 : index
    %10 = vector.load %arg4[%c0_5, %c0_6] : memref<1x1xf32, #tpu.memory_space<vmem>>, vector<1x1xf32>
    %11 = vector.broadcast %10 : vector<1x1xf32> to vector<1x128xf32>
    %12 = arith.addf %9, %11 : vector<1x128xf32>
    %c0_7 = arith.constant 0 : index
    %c0_8 = arith.constant 0 : index
    %13 = vector.load %arg6[%c0_7, %c0_8] : memref<1x1xf32, #tpu.memory_space<vmem>>, vector<1x1xf32>
    %cst_9 = arith.constant dense<0xFF800000> : vector<1xf32>
    %14 = vector.multi_reduction <maximumf>, %12, %cst_9 [1] : vector<1x128xf32> to vector<1xf32>
    %15 = vector.shape_cast %14 : vector<1xf32> to vector<1x1xf32>
    %16 = arith.maximumf %13, %15 : vector<1x1xf32>
    %c0_10 = arith.constant 0 : index
    %c0_11 = arith.constant 0 : index
    %17 = vector.load %arg6[%c0_10, %c0_11] : memref<1x1xf32, #tpu.memory_space<vmem>>, vector<1x1xf32>
    %18 = arith.subf %17, %16 : vector<1x1xf32>
    %19 = math.exp %18 : vector<1x1xf32>
    %20 = vector.broadcast %16 : vector<1x1xf32> to vector<1x128xf32>
    %21 = arith.subf %12, %20 : vector<1x128xf32>
    %22 = math.exp %21 : vector<1x128xf32>
    %c0_12 = arith.constant 0 : index
    %c0_13 = arith.constant 0 : index
    %23 = vector.load %arg7[%c0_12, %c0_13] : memref<1x1xf32, #tpu.memory_space<vmem>>, vector<1x1xf32>
    %24 = arith.mulf %19, %23 : vector<1x1xf32>
    %cst_14 = arith.constant dense<0.000000e+00> : vector<1xf32>
    %25 = vector.multi_reduction <add>, %22, %cst_14 [1] : vector<1x128xf32> to vector<1xf32>
    %26 = vector.shape_cast %25 : vector<1xf32> to vector<1x1xf32>
    %27 = arith.addf %24, %26 : vector<1x1xf32>
    %c0_15 = arith.constant 0 : index
    %c0_16 = arith.constant 0 : index
    %28 = vector.load %arg7[%c0_15, %c0_16] : memref<1x1xf32, #tpu.memory_space<vmem>>, vector<1x1xf32>
    tpu.vector_store %arg7[%c0_15, %c0_16], %27 {strides = array<i32>} : memref<1x1xf32, #tpu.memory_space<vmem>>, vector<1x1xf32>,
    %c0_17 = arith.constant 0 : index
    %c0_18 = arith.constant 0 : index
    %29 = vector.load %arg8[%c0_17, %c0_18] : memref<4x1xf32, #tpu.memory_space<vmem>>, vector<4x1xf32>
    %30 = vector.broadcast %19 : vector<1x1xf32> to vector<4x1xf32>
    %31 = arith.mulf %30, %29 : vector<4x1xf32>
    %32 = vector.broadcast %22 : vector<1x128xf32> to vector<4x128xf32>
    %33 = arith.mulf %4, %32 : vector<4x128xf32>
    %cst_19 = arith.constant dense<0.000000e+00> : vector<4xf32>
    %34 = vector.multi_reduction <add>, %33, %cst_19 [1] : vector<4x128xf32> to vector<4xf32>
    %35 = vector.shape_cast %34 : vector<4xf32> to vector<4x1xf32>
    %36 = arith.addf %31, %35 : vector<4x1xf32>
    %c0_20 = arith.constant 0 : index
    %c0_21 = arith.constant 0 : index
    %37 = vector.load %arg8[%c0_20, %c0_21] : memref<4x1xf32, #tpu.memory_space<vmem>>, vector<4x1xf32>
    tpu.vector_store %arg8[%c0_20, %c0_21], %36 {strides = array<i32>} : memref<4x1xf32, #tpu.memory_space<vmem>>, vector<4x1xf32>,
    %c0_22 = arith.constant 0 : index
    %c0_23 = arith.constant 0 : index
    %38 = vector.load %arg6[%c0_22, %c0_23] : memref<1x1xf32, #tpu.memory_space<vmem>>, vector<1x1xf32>
    tpu.vector_store %arg6[%c0_22, %c0_23], %16 {strides = array<i32>} : memref<1x1xf32, #tpu.memory_space<vmem>>, vector<1x1xf32>,
    %c1_i32 = arith.constant 1 : i32
    %39 = arith.cmpi eq, %arg1, %c1_i32 : i32
    %40 = arith.extui %39 : i1 to i32
    %c0_i32_24 = arith.constant 0 : i32
    %41 = arith.cmpi ne, %40, %c0_i32_24 : i32
    scf.if %41 {
      %c0_25 = arith.constant 0 : index
      %c0_26 = arith.constant 0 : index
      %42 = vector.load %arg8[%c0_25, %c0_26] : memref<4x1xf32, #tpu.memory_space<vmem>>, vector<4x1xf32>
      %c0_27 = arith.constant 0 : index
      %c0_28 = arith.constant 0 : index
      %43 = vector.load %arg7[%c0_27, %c0_28] : memref<1x1xf32, #tpu.memory_space<vmem>>, vector<1x1xf32>
      %44 = tpu.reciprocal %43 : vector<1x1xf32> -> vector<1x1xf32>
      %45 = vector.broadcast %44 : vector<1x1xf32> to vector<4x1xf32>
      %46 = arith.mulf %42, %45 : vector<4x1xf32>
      %c0_29 = arith.constant 0 : index
      %c0_30 = arith.constant 0 : index
      %c0_31 = arith.constant 0 : index
      %47 = vector.load %arg5[%c0_29, %c0_30, %c0_31] : memref<1x4x1xf32, #tpu.memory_space<vmem>>, vector<1x4x1xf32>
      %48 = vector.shape_cast %47 : vector<1x4x1xf32> to vector<4x1xf32>
      %49 = vector.shape_cast %46 : vector<4x1xf32> to vector<1x4x1xf32>
      tpu.vector_store %arg5[%c0_29, %c0_30, %c0_31], %49 {strides = array<i32>} : memref<1x4x1xf32, #tpu.memory_space<vmem>>, vector<1x4x1xf32>,
    } else {
    }
    return
  }
  func.func @transform_0(%arg0: i32, %arg1: i32) -> (i32, i32, i32) {
    %c0_i32 = arith.constant 0 : i32
    %c0_i32_0 = arith.constant 0 : i32
    return %arg0, %c0_i32, %arg1 : i32, i32, i32
  }
  func.func @transform_1(%arg0: i32, %arg1: i32) -> (i32, i32) {
    %c0_i32 = arith.constant 0 : i32
    %c0_i32_0 = arith.constant 0 : i32
    %c0_i32_1 = arith.constant 0 : i32
    return %c0_i32, %c0_i32_0 : i32, i32
  }
  func.func @transform_2(%arg0: i32, %arg1: i32) -> (i32, i32) {
    %c0_i32 = arith.constant 0 : i32
    %c0_i32_0 = arith.constant 0 : i32
    %c0_i32_1 = arith.constant 0 : i32
    return %c0_i32, %c0_i32_0 : i32, i32
  }
  func.func @transform_3(%arg0: i32, %arg1: i32) -> (i32, i32, i32) {
    %c0_i32 = arith.constant 0 : i32
    %c0_i32_0 = arith.constant 0 : i32
    %c0_i32_1 = arith.constant 0 : i32
    return %arg0, %c0_i32, %c0_i32_0 : i32, i32, i32
  }
}

module attributes {stable_mosaic.version = 11 : i64} {
  func.func @_fuse_kernel(%arg0: i32, %arg1: i32, %arg2: memref<1x4x128xf32, #tpu.memory_space<vmem>>, %arg3: memref<1x4x1xf32, #tpu.memory_space<vmem>>, %arg4: memref<2x4xf32, #tpu.memory_space<vmem>>, %arg5: memref<2x1xf32, #tpu.memory_space<vmem>>, %arg6: memref<2x1xf32, #tpu.memory_space<vmem>>, %arg7: memref<2x1xf32, #tpu.memory_space<vmem>>, %arg8: memref<4x2xf32, #tpu.memory_space<vmem>>, %arg9: memref<4x1xf32, #tpu.memory_space<vmem>>, %arg10: memref<1x4x128xf32, #tpu.memory_space<vmem>>, %arg11: memref<4x1xf32, #tpu.memory_space<vmem>>) attributes {dimension_semantics = [#tpu.dimension_semantics<parallel>, #tpu.dimension_semantics<arbitrary>], iteration_bounds = array<i64: 2, 2>, scalar_prefetch = 0 : i64, scratch_operands = 1 : i64, tpu.core_type = #tpu.core_type<tc>, window_params = [{transform_indices = @transform_0, window_bounds = array<i64: 1, 4, 128>}, {transform_indices = @transform_1, window_bounds = array<i64: 1, 4, 1>}, {pipeline_mode = #tpu.pipeline_mode<synchronous>, transform_indices = @transform_2, window_bounds = array<i64: 2, 4>}, {pipeline_mode = #tpu.pipeline_mode<synchronous>, transform_indices = @transform_3, window_bounds = array<i64: 2, 1>}, {pipeline_mode = #tpu.pipeline_mode<synchronous>, transform_indices = @transform_4, window_bounds = array<i64: 2, 1>}, {pipeline_mode = #tpu.pipeline_mode<synchronous>, transform_indices = @transform_5, window_bounds = array<i64: 2, 1>}, {pipeline_mode = #tpu.pipeline_mode<synchronous>, transform_indices = @transform_6, window_bounds = array<i64: 4, 2>}, {pipeline_mode = #tpu.pipeline_mode<synchronous>, transform_indices = @transform_7, window_bounds = array<i64: 4, 1>}, {transform_indices = @transform_8, window_bounds = array<i64: 1, 4, 128>}]} {
    %c0_i32 = arith.constant 0 : i32
    %0 = arith.cmpi eq, %arg1, %c0_i32 : i32
    %1 = arith.extui %0 : i1 to i32
    %c0_i32_0 = arith.constant 0 : i32
    %2 = arith.cmpi ne, %1, %c0_i32_0 : i32
    scf.if %2 {
      %c0_8 = arith.constant 0 : index
      %c0_9 = arith.constant 0 : index
      %c0_10 = arith.constant 0 : index
      %11 = vector.load %arg3[%c0_8, %c0_9, %c0_10] : memref<1x4x1xf32, #tpu.memory_space<vmem>>, vector<1x4x1xf32>
      %12 = vector.shape_cast %11 : vector<1x4x1xf32> to vector<4x1xf32>
      %c0_11 = arith.constant 0 : index
      %c0_12 = arith.constant 0 : index
      %13 = vector.load %arg4[%c0_11, %c0_12] : memref<2x4xf32, #tpu.memory_space<vmem>>, vector<2x4xf32>
      %cst = arith.constant dense<0.000000e+00> : vector<2x1xf32>
      %14 = tpu.matmul %13, %12, %cst {dimension_numbers = #tpu.dot_dimension_numbers<[1], [0], [0], [1], [0, 0, 1, 1], [], []>} : vector<2x4xf32>, vector<4x1xf32>, vector<2x1xf32> -> vector<2x1xf32>
      %c0_13 = arith.constant 0 : index
      %c0_14 = arith.constant 0 : index
      %15 = vector.load %arg5[%c0_13, %c0_14] : memref<2x1xf32, #tpu.memory_space<vmem>>, vector<2x1xf32>
      %16 = arith.addf %14, %15 : vector<2x1xf32>
      %cst_15 = arith.constant dense<0.000000e+00> : vector<1xf32>
      %17 = vector.multi_reduction <add>, %16, %cst_15 [0] : vector<2x1xf32> to vector<1xf32>
      %18 = vector.shape_cast %17 : vector<1xf32> to vector<1x1xf32>
      %cst_16 = arith.constant 2.000000e+00 : f32
      %19 = vector.broadcast %cst_16 : f32 to vector<1x1xf32>
      %20 = arith.divf %18, %19 : vector<1x1xf32>
      %21 = vector.broadcast %20 : vector<1x1xf32> to vector<2x1xf32>
      %22 = arith.subf %16, %21 : vector<2x1xf32>
      %23 = arith.mulf %22, %22 : vector<2x1xf32>
      %cst_17 = arith.constant dense<0.000000e+00> : vector<1xf32>
      %24 = vector.multi_reduction <add>, %23, %cst_17 [0] : vector<2x1xf32> to vector<1xf32>
      %25 = vector.shape_cast %24 : vector<1xf32> to vector<1x1xf32>
      %cst_18 = arith.constant 2.000000e+00 : f32
      %26 = vector.broadcast %cst_18 : f32 to vector<1x1xf32>
      %27 = arith.divf %25, %26 : vector<1x1xf32>
      %28 = vector.broadcast %20 : vector<1x1xf32> to vector<2x1xf32>
      %29 = arith.subf %16, %28 : vector<2x1xf32>
      %cst_19 = arith.constant 9.99999974E-6 : f32
      %30 = vector.broadcast %cst_19 : f32 to vector<1x1xf32>
      %31 = arith.addf %27, %30 : vector<1x1xf32>
      %32 = math.rsqrt %31 : vector<1x1xf32>
      %33 = vector.broadcast %32 : vector<1x1xf32> to vector<2x1xf32>
      %34 = arith.mulf %29, %33 : vector<2x1xf32>
      %c0_20 = arith.constant 0 : index
      %c0_21 = arith.constant 0 : index
      %35 = vector.load %arg6[%c0_20, %c0_21] : memref<2x1xf32, #tpu.memory_space<vmem>>, vector<2x1xf32>
      %36 = arith.mulf %34, %35 : vector<2x1xf32>
      %c0_22 = arith.constant 0 : index
      %c0_23 = arith.constant 0 : index
      %37 = vector.load %arg7[%c0_22, %c0_23] : memref<2x1xf32, #tpu.memory_space<vmem>>, vector<2x1xf32>
      %38 = arith.addf %36, %37 : vector<2x1xf32>
      %cst_24 = arith.constant 0.000000e+00 : f32
      %39 = vector.broadcast %cst_24 : f32 to vector<2x1xf32>
      %40 = arith.maximumf %38, %39 : vector<2x1xf32>
      %c0_25 = arith.constant 0 : index
      %c0_26 = arith.constant 0 : index
      %41 = vector.load %arg8[%c0_25, %c0_26] : memref<4x2xf32, #tpu.memory_space<vmem>>, vector<4x2xf32>
      %cst_27 = arith.constant dense<0.000000e+00> : vector<4x1xf32>
      %42 = tpu.matmul %41, %40, %cst_27 {dimension_numbers = #tpu.dot_dimension_numbers<[1], [0], [0], [1], [0, 0, 1, 1], [], []>} : vector<4x2xf32>, vector<2x1xf32>, vector<4x1xf32> -> vector<4x1xf32>
      %c0_28 = arith.constant 0 : index
      %c0_29 = arith.constant 0 : index
      %43 = vector.load %arg9[%c0_28, %c0_29] : memref<4x1xf32, #tpu.memory_space<vmem>>, vector<4x1xf32>
      %44 = arith.addf %42, %43 : vector<4x1xf32>
      %c0_30 = arith.constant 0 : index
      %c0_31 = arith.constant 0 : index
      %45 = vector.load %arg11[%c0_30, %c0_31] : memref<4x1xf32, #tpu.memory_space<vmem>>, vector<4x1xf32>
      tpu.vector_store %arg11[%c0_30, %c0_31], %44 {strides = array<i32>} : memref<4x1xf32, #tpu.memory_space<vmem>>, vector<4x1xf32>,
    } else {
    }
    %c0 = arith.constant 0 : index
    %c0_1 = arith.constant 0 : index
    %c0_2 = arith.constant 0 : index
    %3 = vector.load %arg2[%c0, %c0_1, %c0_2] : memref<1x4x128xf32, #tpu.memory_space<vmem>>, vector<1x4x128xf32>
    %4 = vector.shape_cast %3 : vector<1x4x128xf32> to vector<4x128xf32>
    %c0_3 = arith.constant 0 : index
    %c0_4 = arith.constant 0 : index
    %5 = vector.load %arg11[%c0_3, %c0_4] : memref<4x1xf32, #tpu.memory_space<vmem>>, vector<4x1xf32>
    %6 = vector.broadcast %5 : vector<4x1xf32> to vector<4x128xf32>
    %7 = arith.addf %4, %6 : vector<4x128xf32>
    %c0_5 = arith.constant 0 : index
    %c0_6 = arith.constant 0 : index
    %c0_7 = arith.constant 0 : index
    %8 = vector.load %arg10[%c0_5, %c0_6, %c0_7] : memref<1x4x128xf32, #tpu.memory_space<vmem>>, vector<1x4x128xf32>
    %9 = vector.shape_cast %8 : vector<1x4x128xf32> to vector<4x128xf32>
    %10 = vector.shape_cast %7 : vector<4x128xf32> to vector<1x4x128xf32>
    tpu.vector_store %arg10[%c0_5, %c0_6, %c0_7], %10 {strides = array<i32>} : memref<1x4x128xf32, #tpu.memory_space<vmem>>, vector<1x4x128xf32>,
    return
  }
  func.func @transform_0(%arg0: i32, %arg1: i32) -> (i32, i32, i32) {
    %c0_i32 = arith.constant 0 : i32
    %c0_i32_0 = arith.constant 0 : i32
    return %arg0, %c0_i32, %arg1 : i32, i32, i32
  }
  func.func @transform_1(%arg0: i32, %arg1: i32) -> (i32, i32, i32) {
    %c0_i32 = arith.constant 0 : i32
    %c0_i32_0 = arith.constant 0 : i32
    %c0_i32_1 = arith.constant 0 : i32
    return %arg0, %c0_i32, %c0_i32_0 : i32, i32, i32
  }
  func.func @transform_2(%arg0: i32, %arg1: i32) -> (i32, i32) {
    %c0_i32 = arith.constant 0 : i32
    %c0_i32_0 = arith.constant 0 : i32
    %c0_i32_1 = arith.constant 0 : i32
    return %c0_i32, %c0_i32_0 : i32, i32
  }
  func.func @transform_3(%arg0: i32, %arg1: i32) -> (i32, i32) {
    %c0_i32 = arith.constant 0 : i32
    %c0_i32_0 = arith.constant 0 : i32
    %c0_i32_1 = arith.constant 0 : i32
    return %c0_i32, %c0_i32_0 : i32, i32
  }
  func.func @transform_4(%arg0: i32, %arg1: i32) -> (i32, i32) {
    %c0_i32 = arith.constant 0 : i32
    %c0_i32_0 = arith.constant 0 : i32
    %c0_i32_1 = arith.constant 0 : i32
    return %c0_i32, %c0_i32_0 : i32, i32
  }
  func.func @transform_5(%arg0: i32, %arg1: i32) -> (i32, i32) {
    %c0_i32 = arith.constant 0 : i32
    %c0_i32_0 = arith.constant 0 : i32
    %c0_i32_1 = arith.constant 0 : i32
    return %c0_i32, %c0_i32_0 : i32, i32
  }
  func.func @transform_6(%arg0: i32, %arg1: i32) -> (i32, i32) {
    %c0_i32 = arith.constant 0 : i32
    %c0_i32_0 = arith.constant 0 : i32
    %c0_i32_1 = arith.constant 0 : i32
    return %c0_i32, %c0_i32_0 : i32, i32
  }
  func.func @transform_7(%arg0: i32, %arg1: i32) -> (i32, i32) {
    %c0_i32 = arith.constant 0 : i32
    %c0_i32_0 = arith.constant 0 : i32
    %c0_i32_1 = arith.constant 0 : i32
    return %c0_i32, %c0_i32_0 : i32, i32
  }
  func.func @transform_8(%arg0: i32, %arg1: i32) -> (i32, i32, i32) {
    %c0_i32 = arith.constant 0 : i32
    %c0_i32_0 = arith.constant 0 : i32
    return %arg0, %c0_i32, %arg1 : i32, i32, i32
  }
}

</mosaic_0001>

<bundles_post_ra>
// kernel: context_block.2
= control target key start
LH: loop header
LB: loop body
LE: loop exit
PB: predicated region body
PF: predicated region fallthrough
CT: control target
= control target key end

     0   :  { %s486_s14 = smov 0   ;;  %s488_s15 = smov 0   ;;  %s553_s0 = inlined_call_operand.vmem [shape: f32[2,4,256], index: 0, kind: input, shape index: {}]   ;;  %s554_s1 = inlined_call_operand.vmem [shape: f32[4,1], index: 1, kind: input, shape index: {}]   ;;  %s555_s2 = inlined_call_operand.<no memory space> [shape: f32[1,1], index: 2, kind: input, shape index: {}]   ;;  %s556_s3 = inlined_call_operand.vmem [shape: f32[2,4,1], index: 3, kind: output, shape index: {}]  }
   0x1   :  { %v8_v0 = vstv %s555_s2  ;;  %s490_s16 = smov 0   ;;  %s492_s17 = smov 0  }
   0x2   :  { %9 = vst [vmem:[#allocation5] sm:$0x1] %v8_v0  ;;  %s494_s18 = smov 0  }
   0x3 LB: > { %s24_s2 = sadd.s32 1, %s450_s16  ;;  %s27_s19 = sadd.s32 1, %s454_s17  ;;  %s458_s18 = sphi %s494_s18, %s15_s18   ;;  %s454_s17 = sphi %s492_s17, %s560_s17   ;;  %s450_s16 = sphi %s490_s16, %s559_s16   ;;  %s446_s15 = sphi %s488_s15, %s558_s15   ;;  %s442_s14 = sphi %s486_s14, %s557_s14  }
   0x4   : > { %p25_p0 = scmp.ge.s32.totalorder %s24_s2, 2  ;;  %p361_p1 = scmp.ge.s32.totalorder %s458_s18, 1 }
   0x5   : > { %p156_p2 = scmp.lt.s32.totalorder %s458_s18, 5 }
   0x6   : > { %s562_s2 = smov (%p25_p0, %s24_s2), 0  ;;  %s564_s19 = smov (!%p25_p0, %s27_s19), %s454_s17 }
   0x7   : > { %p157_p3 = pnand %p361_p1, %p156_p2  ;;  %p29_p4 = scmp.ge.s32.totalorder %s564_s19, 2 }
   0x8   : > { %p182_p5 = scmp.lt.s32.totalorder (!%p157_p3), %s446_s15, 1  ;;  %p184_p6 = scmp.lt.s32.totalorder (!%p157_p3), %s442_s14, 1 }
   0x9   : > { %s566_s19 = smov (%p29_p4, %s564_s19), 0  ;;  %160 = sbr.rel (%p157_p3) target bundleno = 627 (0x273), region = 32 }
   0xa   : > { %p365_p7 = scmp.ne.s32.totalorder (!%p157_p3), %s442_s14, 0 }
  0x10   : > { %s568_s15 = smov (!%p182_p5, %s446_s15), 1  ;;  %197 = sbr.rel (%p365_p7) target bundleno = 23 (0x17), region = 36 }
  0x11   : > { %s185_s20 = scalar_select %p184_p6, %s442_s14, 1 }
  0x12   : > { %s362_s21 = sshll.u32 %s568_s15, 1  ;;  %s364_s22 = sshll.u32 %s568_s15, 2  ;;  %vm198_vm0 = vcmask (!%p365_p7), 0   ;;  %vm201_vm1 = vcmask (!%p365_p7), 3072   ;;  %v460_v1 = vmov (!%p365_p7), -1e+30  }
  0x13   : > { %s187_s23 = sadd.s32 %s362_s21, %s185_s20  ;;  %s523_s26 = scalar_lea.vmem %s556_s3, %s364_s22  ;;  %199 = vst.msk [vmem:[#allocation2] sm:$0x1] (!%p365_p7), %vm198_vm0, %v460_v1  ;;  %v461_v2 = vmov (!%p365_p7), 0.0  }
  0x14   : > { %s363_s27 = sshll.u32 %s187_s23, 2  ;;  %200 = vst.msk [vmem:[#allocation3] sm:$0x1] (!%p365_p7), %vm198_vm0, %v461_v2 }
  0x15   : > { %s189_s30 = scalar_lea.vmem %s553_s0, %s363_s27  ;;  %202 = vst.msk [vmem:[#allocation4] sm:$0xf] (!%p365_p7), %vm201_vm1, %v461_v2 }
  0x17 PF: > { %v204_v3 = vld [vmem:[%s554_s1] sm:$0xf]  ;;  %v462_v4 = vmov 0   ;;  %v219_v5 = vld [vmem:[#allocation5] sm:$0x1]  ;;  %vm211_vm2 = vcmask 1043456   ;;  %v225_v9 = vlaneseq }
  0x18   : > { %412 = vset.pattern.permute.xlu0 %v462_v4  ;;  %413 = vset.pattern.permute.xlu1 %v462_v4  ;;  %v203_v6 = vld [vmem:[%s189_s30] sm:$0xf]  ;;  %vm254_vm3 = vcmask 0   ;;  %vm269_vm4 = vcmask 3072   ;;  %p366_p8 = scmp.ne.s32.totalorder %s442_s14, 1 }
  0x19   : > { %207 = vperm.xlu0 %412, %v204_v3   ;;  %v226_v13 = vshrl.u32 %v225_v9, 7 }
  0x1a   : > { %v230_v22 = vld [vmem:[#allocation2] sm:$0x1] }
  0x1b   : > { %v227_v15 = vsub.s32 0, %v226_v13  ;;  %v249_v35 = vld [vmem:[#allocation3] sm:$0x1] }
  0x1c   : > { %v256_v38 = vld [vmem:[#allocation4] sm:$0xf] }
  0x1d   : > { %222 = vperm.xlu0 %412, %v219_v5  }
  0x98   : > { %v208_v7 = vpop.permute.xlu0 %207 }
  0x99   : > { %v210_v8 = vmul.f32 %v208_v7, %v203_v6 }
  0x9b   : > { %v212_v10 = vsel %vm211_vm2, %v210_v8, 0.0 }
  0x9c   : > { %v213_v11 = vrot.slane %v212_v10, 4  ;;  %v223_v17 = vpop.permute.xlu0 %222 }
  0x9d   : > { %v228_v19 = vrot.slane %v223_v17, %v227_v15 }
  0x9e   : > { %v214_v12 = vadd.f32 %v213_v11, %v212_v10 }
  0xa0   : > { %v215_v14 = vrot.slane %v214_v12, 2 }
  0xa2   : > { %v216_v16 = vadd.f32 %v215_v14, %v214_v12 }
  0xa4   : > { %v217_v18 = vrot.slane %v216_v16, 1 }
  0xa6   : > { %v218_v20 = vadd.f32 %v217_v18, %v216_v16 }
  0xa8   : > { %v229_v21 = vadd.f32 %v228_v19, %v218_v20 }
  0xaa   : > { %231 = vmax.xlane.f32.xlu1 %v229_v21 }
 0x137   : > { %v232_v23 = vpop.xlane.xlu1 %231 }
 0x138   : > { %v233_v24 = vmax.f32 %v230_v22, %v232_v23 }
 0x13a   : > { %v234_v25 = vsub.f32 %v230_v22, %v233_v24  ;;  %271 = vst.msk [vmem:[#allocation2] sm:$0x1] %vm254_vm3, %v233_v24  ;;  %239 = vperm.xlu1 %413, %v233_v24  }
 0x13c   : > { %v235_v33 = vmul.f32 1.442695, %v234_v25 }
 0x1b9   : > { %v240_v26 = vpop.permute.xlu1 %239 }
 0x1ba   : > { %v245_v27 = vrot.slane %v240_v26, %v227_v15 }
 0x1bc   : > { %v246_v28 = vsub.f32 %v229_v21, %v245_v27 }
 0x1be   : > { %v247_v29 = vmul.f32 1.442695, %v246_v28 }
 0x1c0   : > { %414 = vpow2.f32 %v247_v29 }
 0x1c1   : > { %416 = vpow2.f32 %v235_v33 }
 0x1ca   : > { %v415_v30 = vpop.eup %414 }
 0x1cb   : > { %251 = vadd.xlane.f32.xlu0 %v415_v30  ;;  %v264_v31 = vmul.f32 %v415_v30, %v203_v6  ;;  %v417_v34 = vpop.eup %416 }
 0x1cc   : > { %v261_v36 = vrot.slane %v417_v34, %v227_v15  ;;  %v250_v37 = vmul.f32 %v417_v34, %v249_v35 }
 0x1cd   : > { %v265_v32 = vsel %vm211_vm2, %v264_v31, 0.0 }
 0x1ce   : > { %266 = vadd.xlane.f32.xlu1 %v265_v32  ;;  %v263_v41 = vmul.f32 %v261_v36, %v256_v38 }
 0x258   : > { %v252_v39 = vpop.xlane.xlu0 %251  ;;  %275 = sbr.rel (%p366_p8) target bundleno = 627 (0x273), region = 40 }
 0x259   : > { %v253_v40 = vadd.f32 %v252_v39, %v250_v37 }
 0x25b   : > { %255 = vst.msk [vmem:[#allocation3] sm:$0x1] %vm254_vm3, %v253_v40  ;;  %v267_v42 = vpop.xlane.xlu1 %266 }
 0x25c   : > { %v268_v43 = vadd.f32 %v267_v42, %v263_v41 }
 0x25e   : > { %270 = vst.msk [vmem:[#allocation4] sm:$0xf] %vm269_vm4, %v268_v43 }
 0x262   : > { %v277_v44 = vld [vmem:[#allocation3] sm:$0x1] }
 0x263   : > { %418 = vrcp.f32 %v277_v44 }
 0x265   : > { %v276_v46 = vld [vmem:[#allocation4] sm:$0xf] }
 0x26d   : > { %v419_v45 = vpop.eup %418 }
 0x26e   : > { %v283_v47 = vrot.slane %v419_v45, %v227_v15 }
 0x270   : > { %v285_v48 = vmul.f32 %v283_v47, %v276_v46 }
 0x272   : > { %286 = vst.msk [vmem:[%s523_s26] sm:$0xf] %vm269_vm4, %v285_v48 }
 0x273 PF: > { %s15_s18 = sadd.s32 1, %s458_s18   ;;  %s557_s14 = smov %s450_s16 }
 0x274   : > { %p12_p9 = scmp.ge.s32.totalorder %s15_s18, 6   ;;  %s558_s15 = smov %s454_s17 }
 0x275   : > { %s559_s16 = smov %s562_s2  ;;  %s560_s17 = smov %s566_s19 }
 0x276   :  { %14 = sbr.rel (!%p12_p9) target bundleno = 3 (0x3), region = 70 }

// kernel: context_block.3
= control target key start
LH: loop header
LB: loop body
LE: loop exit
PB: predicated region body
PF: predicated region fallthrough
CT: control target
= control target key end

     0   :  { %s821_s27 = smov 0   ;;  %s823_s28 = smov 0   ;;  %s899_s0 = inlined_call_operand.vmem [shape: f32[2,4,256], index: 0, kind: input, shape index: {}, may-alias: {0,8}]   ;;  %s900_s1 = inlined_call_operand.vmem [shape: f32[2,4,1], index: 1, kind: input, shape index: {}]   ;;  %s901_s2 = inlined_call_operand.vmem [shape: f32[2,4], index: 2, kind: input, shape index: {}]   ;;  %s902_s3 = inlined_call_operand.vmem [shape: f32[2,1], index: 3, kind: input, shape index: {}]   ;;  %s903_s4 = inlined_call_operand.vmem [shape: f32[2,1], index: 4, kind: input, shape index: {}]   ;;  %s904_s5 = inlined_call_operand.vmem [shape: f32[2,1], index: 5, kind: input, shape index: {}]   ;;  %s905_s6 = inlined_call_operand.vmem [shape: f32[4,2], index: 6, kind: input, shape index: {}]   ;;  %s906_s7 = inlined_call_operand.vmem [shape: f32[4,1], index: 7, kind: input, shape index: {}]   ;;  %s907_s8 = inlined_call_operand.vmem [shape: f32[2,4,256], index: 8, kind: output, shape index: {}, may-alias: {0,8}]  }
   0x1   :  { %s825_s29 = smov 0   ;;  %s827_s30 = smov 0  }
   0x2   :  { %s829_s9 = smov 0  }
   0x3 LB: > { %s27_s10 = sadd.s32 1, %s763_s29  ;;  %s30_s11 = sadd.s32 1, %s767_s30  ;;  %s771_s9 = sphi %s829_s9, %s18_s9   ;;  %s767_s30 = sphi %s827_s30, %s911_s30   ;;  %s763_s29 = sphi %s825_s29, %s910_s29   ;;  %s759_s28 = sphi %s823_s28, %s909_s28   ;;  %s755_s27 = sphi %s821_s27, %s908_s27  }
   0x4   : > { %p28_p0 = scmp.ge.s32.totalorder %s27_s10, 2  ;;  %p660_p1 = scmp.ge.s32.totalorder %s771_s9, 1 }
   0x5   : > { %p290_p2 = scmp.lt.s32.totalorder %s771_s9, 5 }
   0x6   : > { %s913_s10 = smov (%p28_p0, %s27_s10), 0  ;;  %s915_s11 = smov (!%p28_p0, %s30_s11), %s767_s30 }
   0x7   : > { %p291_p3 = pnand %p660_p1, %p290_p2  ;;  %p32_p4 = scmp.ge.s32.totalorder %s915_s11, 2 }
   0x8   : > { %p334_p5 = scmp.lt.s32.totalorder (!%p291_p3), %s759_s28, 1  ;;  %p336_p6 = scmp.lt.s32.totalorder (!%p291_p3), %s755_s27, 1 }
   0x9   : > { %s917_s11 = smov (%p32_p4, %s915_s11), 0  ;;  %294 = sbr.rel (%p291_p3) target bundleno = 645 (0x285), region = 52 }
   0xa   : > { %p666_p7 = scmp.ne.s32.totalorder (!%p291_p3), %s755_s27, 0 }
  0x10   : > { %s919_s28 = smov (!%p334_p5, %s759_s28), 1  ;;  %357 = sbr.rel (%p666_p7) target bundleno = 507 (0x1fb), region = 56 }
  0x11   : > { %s337_s12 = scalar_select %p336_p6, %s755_s27, 1 }
  0x12   : > { %s661_s13 = sshll.u32 %s919_s28, 1  ;;  %s663_s14 = sshll.u32 %s919_s28, 2  ;;  %vm365_vm0 = vcmask (!%p666_p7), 1043456   ;;  %vm361_vm1 = vcmask (!%p666_p7), 31744   ;;  %v773_v1 = vmov (!%p666_p7), 0.0   ;;  %vm774_vm2 = vmmov (!%p666_p7), 0  }
  0x13   : > { %s339_s15 = sadd.s32 %s661_s13, %s337_s12  ;;  %s345_s18 = scalar_lea.vmem %s900_s1, %s663_s14  ;;  %677 = vmatprep.subr.mxu0 (!%p666_p7), %v773_v1  ;;  %679 = vmatprep.mubr.msk.f32.mxu0 (!%p666_p7), %vm774_vm2, %v773_v1  ;;  %v359_v2 = vld [vmem:[%s901_s2] sm:$0x3] (!%p666_p7)  ;;  %vm439_vm3 = vcmask (!%p666_p7), 1024   ;;  %vm473_vm4 = vcmask (!%p666_p7), 1041408   ;;  %vm469_vm5 = vcmask (!%p666_p7), 15360   ;;  %vm547_vm6 = vcmask (!%p666_p7), 3072  }
  0x14   : > { %s662_s19 = sshll.u32 %s339_s15, 2  ;;  %v358_v0 = vld [vmem:[%s345_s18] sm:$0xf] (!%p666_p7)  ;;  %682 = vmatprep.subr.mxu1 (!%p666_p7), %v773_v1  ;;  %684 = vmatprep.mubr.msk.f32.mxu1 (!%p666_p7), %vm774_vm2, %v773_v1 }
  0x15   : > { %s857_s22 = scalar_lea.vmem %s899_s0, %s662_s19  ;;  %s862_s25 = scalar_lea.vmem %s907_s8, %s662_s19  ;;  %678 = vmatpush3.msk.msra.mxu0 (!%p666_p7), %vm365_vm0, %v358_v0  ;;  %v360_v3 = vld [vmem:[%s902_s3] sm:$0x3] (!%p666_p7) }
  0x16   : > { %680 = vmatmul.mubr.msk.f32.vlgmr.msra.gmra.mrb[0].mxu0 (!%p666_p7), %vm361_vm1, %v359_v2  ;;  %v462_v27 = vld [vmem:[%s903_s4] sm:$0x3] (!%p666_p7) }
  0x17   : > { %v464_v29 = vld [vmem:[%s904_s5] sm:$0x3] }
  0x18   : > { %v467_v33 = vld [vmem:[%s905_s6] sm:$0xf] }
  0x19   : > { %v468_v34 = vld [vmem:[%s906_s7] sm:$0xf] }
  0xe9   : > { %v435_v4 = vpop.f32.mrb[0].mxu0 }
  0xea   : > { %v436_v5 = vadd.f32 %v435_v4, %v360_v3  ;;  %v681_v6 = vpop.f32.mrb[1].mxu0 }
  0xec   : > { %v440_v7 = vsel %vm439_vm3, %v436_v5, 0.0 }
  0xed   : > { %v441_v8 = vrot.slane %v440_v7, 4 }
  0xef   : > { %v442_v9 = vadd.f32 %v441_v8, %v440_v7 }
  0xf1   : > { %v443_v10 = vrot.slane %v442_v9, 2 }
  0xf3   : > { %v444_v11 = vadd.f32 %v443_v10, %v442_v9 }
  0xf5   : > { %v445_v12 = vrot.slane %v444_v11, 1 }
  0xf7   : > { %v446_v13 = vadd.f32 %v445_v12, %v444_v11 }
  0xf9   : > { %v448_v14 = vmul.f32 0.5, %v446_v13 }
  0xfb   : > { %v449_v15 = vsub.f32 %v436_v5, %v448_v14 }
  0xfd   : > { %v450_v16 = vmul.f32 %v449_v15, %v449_v15 }
  0xff   : > { %v451_v17 = vsel %vm439_vm3, %v450_v16, 0.0 }
 0x100   : > { %v452_v18 = vrot.slane %v451_v17, 4 }
 0x102   : > { %v453_v19 = vadd.f32 %v452_v18, %v451_v17 }
 0x104   : > { %v454_v20 = vrot.slane %v453_v19, 2 }
 0x106   : > { %v455_v21 = vadd.f32 %v454_v20, %v453_v19 }
 0x108   : > { %v456_v22 = vrot.slane %v455_v21, 1 }
 0x10a   : > { %v457_v23 = vadd.f32 %v456_v22, %v455_v21 }
 0x10c   : > { %v458_v24 = vmul.f32 0.5, %v457_v23 }
 0x10e   : > { %v459_v25 = vadd.f32 1e-05, %v458_v24 }
 0x110   : > { %730 = vrsqrt.f32 %v459_v25 }
 0x11a   : > { %v731_v26 = vpop.eup %730 }
 0x11b   : > { %v461_v28 = vmul.f32 %v731_v26, %v449_v15 }
 0x11d   : > { %v463_v30 = vmul.f32 %v462_v27, %v461_v28 }
 0x11f   : > { %v465_v31 = vadd.f32 %v464_v29, %v463_v30 }
 0x121   : > { %v466_v32 = vmax.f32 %v465_v31, 0.0 }
 0x123   : > { %683 = vmatpush3.msk.msra.mxu1 %vm473_vm4, %v466_v32 }
 0x124   : > { %685 = vmatmul.mubr.msk.f32.vlgmr.msra.gmra.mrb[0].mxu1 %vm469_vm5, %v467_v33 }
 0x1f7   : > { %v543_v35 = vpop.f32.mrb[0].mxu1 }
 0x1f8   : > { %v544_v36 = vadd.f32 %v543_v35, %v468_v34  ;;  %v686_v37 = vpop.f32.mrb[1].mxu1 }
 0x1fa   : > { %548 = vst.msk [vmem:[#allocation2] sm:$0xf] %vm547_vm6, %v544_v36 }
 0x1fb PF: > { %v775_v39 = vmov 0   ;;  %v549_v40 = vld [vmem:[%s857_s22] sm:$0xf] }
 0x1fc   : > { %732 = vset.pattern.permute.xlu0 %v775_v39 }
 0x201   : > { %v550_v38 = vld [vmem:[#allocation2] sm:$0xf] }
 0x202   : > { %553 = vperm.xlu0 %732, %v550_v38  }
 0x281   : > { %v554_v41 = vpop.permute.xlu0 %553 }
 0x282   : > { %v556_v42 = vadd.f32 %v554_v41, %v549_v40 }
 0x284   : > { %557 = vst [vmem:[%s862_s25] sm:$0xf] %v556_v42 }
 0x285 PF: > { %s18_s9 = sadd.s32 1, %s771_s9   ;;  %s908_s27 = smov %s763_s29 }
 0x286   : > { %p15_p8 = scmp.ge.s32.totalorder %s18_s9, 6   ;;  %s909_s28 = smov %s767_s30 }
 0x287   : > { %s910_s29 = smov %s913_s10  ;;  %s911_s30 = smov %s917_s11 }
 0x288   :  { %17 = sbr.rel (!%p15_p8) target bundleno = 3 (0x3), region = 89 }

</bundles_post_ra>
